<compile_context>
chip_gen: v5e
topology: v5e:2x2
jax: 0.10.0
libtpu: 0.0.40
codegen_flags: <defaults>
</compile_context>

<pallas_src>
import jax
import jax.numpy as jnp
from jax.experimental import pallas as pl
from jax.experimental.pallas import tpu as pltpu


def _normalize_kernel(scale_ref, bias_ref, x_ref, o_ref):
    # scale_ref / bias_ref: VMEM (block_r, 1) f32 -> broadcast along lanes.
    # x_ref / o_ref:        VMEM (block_r, block_l)
    x = x_ref[...].astype(jnp.float32)
    o_ref[...] = (x * scale_ref[...] + bias_ref[...]).astype(o_ref.dtype)


def _vmem_capacity_bytes():
    try:
        return int(pltpu.get_tpu_info().vmem_capacity_bytes)
    except Exception:
        # Conservative default: v7x per-TC VMEM (smallest current generation).
        return 64 * 1024 * 1024


def _largest_divisor_multiple(dim, unit, cap):
    """Largest multiple of `unit` that divides `dim` and is <= cap (>= unit).

    `dim` must be a multiple of `unit` (guaranteed by row padding / the lane
    check at the call sites), so this can never fall back to an over-budget
    full-dimension block.
    """
    assert dim % unit == 0
    best = unit
    b = unit
    cap = min(cap, dim)
    while b <= cap:
        if dim % b == 0:
            best = b
        b += unit
    return best


def normalize_by_channel_mean_std(x, mean, std):
    """(x - mean[None,:,None,None]) / std[None,:,None,None] for NCHW x."""
    N, C, H, W = x.shape
    R = N * C
    L = H * W
    itemsize = jnp.dtype(x.dtype).itemsize

    # Sub-32-bit dtypes pack along sublanes: (8,128) f32, (16,128) bf16,
    # (32,128) int8/fp8.
    sublane_unit = {4: 8, 2: 16, 1: 32}.get(itemsize, 8)

    # Precompute affine params in f32: y = x * (1/std) + (-mean/std).
    scale = 1.0 / std.astype(jnp.float32)                        # (C,)
    bias = -mean.astype(jnp.float32) * scale                     # (C,)
    scale_rows = jnp.tile(scale, N).reshape(R, 1)                # (N*C, 1) f32
    bias_rows = jnp.tile(bias, N).reshape(R, 1)                  # (N*C, 1) f32

    x2d = x.reshape(R, L)

    # Pad rows up to the sublane packing unit so block_r always divides the
    # row count and the VMEM budget is always respected (padded rows sliced
    # off after the call).
    R_pad = ((R + sublane_unit - 1) // sublane_unit) * sublane_unit
    if R_pad != R:
        pad = R_pad - R
        x2d = jnp.pad(x2d, ((0, pad), (0, 0)))
        scale_rows = jnp.pad(scale_rows, ((0, pad), (0, 0)), constant_values=1.0)
        bias_rows = jnp.pad(bias_rows, ((0, pad), (0, 0)))

    # Generation-aware per-block byte budget (~capacity/16): big enough to
    # amortize the ~0.35us per-grid-step overhead (matters most on v7x's
    # 3.2 TB/s HBM), small enough that double-buffered in+out plus f32
    # scratch stays comfortably inside VMEM on every generation.
    vmem_cap = _vmem_capacity_bytes()
    block_budget = max(vmem_cap // 16, 1 << 20)

    # Lane dim: prefer full rows (one contiguous HBM DMA per block, no j axis).
    # Only split lanes when even a sublane-unit-high full-row block blows the
    # budget (and then only if L is 128-divisible so the split is legal).
    if L % 128 == 0 and L * itemsize * sublane_unit > block_budget:
        block_l = _largest_divisor_multiple(
            L, 128, max(128, block_budget // (itemsize * sublane_unit)))
    else:
        block_l = L

    row_bytes = block_l * itemsize
    max_rows = max(sublane_unit, block_budget // max(1, row_bytes))
    block_r = _largest_divisor_multiple(R_pad, sublane_unit, max_rows)

    # Guarantee >= 2 grid steps when a split exists so both of v7x's
    # TensorCores get work (harmless one extra cheap step on v5e/v6e).
    if (R_pad // block_r) * (L // block_l) == 1:
        if R_pad // sublane_unit >= 2:
            block_r = _largest_divisor_multiple(R_pad, sublane_unit, R_pad // 2)
        elif block_l == L and L % 128 == 0 and L // 128 >= 2:
            block_l = _largest_divisor_multiple(L, 128, L // 2)

    grid = (R_pad // block_r, L // block_l)

    # Scoped-VMEM limit: 2x in + 2x out (double-buffered) + f32 intermediate
    # + slack; never above physical capacity.
    block_bytes = block_r * block_l * itemsize
    vmem_needed = 4 * block_bytes + block_r * block_l * 4 + (2 << 20)
    vmem_limit = int(min(vmem_cap, max(vmem_needed, 32 << 20)))

    out2d = pl.pallas_call(
        _normalize_kernel,
        out_shape=jax.ShapeDtypeStruct((R_pad, L), x.dtype),
        grid=grid,
        in_specs=[
            pl.BlockSpec((block_r, 1), lambda i, j: (i, 0)),
            pl.BlockSpec((block_r, 1), lambda i, j: (i, 0)),
            pl.BlockSpec((block_r, block_l), lambda i, j: (i, j)),
        ],
        out_specs=pl.BlockSpec((block_r, block_l), lambda i, j: (i, j)),
        compiler_params=pltpu.CompilerParams(
            dimension_semantics=("parallel", "parallel"),
            vmem_limit_bytes=vmem_limit,
        ),
        cost_estimate=pl.CostEstimate(
            flops=2 * R_pad * L,
            transcendentals=0,
            bytes_accessed=2 * R_pad * L * itemsize + 2 * R_pad * 4,
        ),
    )(scale_rows, bias_rows, x2d)

    if R_pad != R:
        out2d = out2d[:R]
    return out2d.reshape(N, C, H, W)


if __name__ == "__main__":
    key = jax.random.PRNGKey(0)
    N, C, H, W = 2, 4, 16, 16

    x = jax.random.normal(key, (N, C, H, W), dtype=jnp.float32)
    # Deterministic "buffer" parameters (module __init__ registers mean/std of shape (C,))
    mean = jnp.array([0.485, 0.456, 0.406, 0.5], dtype=jnp.float32)
    std = jnp.array([0.229, 0.224, 0.225, 0.25], dtype=jnp.float32)

    out = normalize_by_channel_mean_std(x, mean, std)
    jax.block_until_ready(out)

    # Reference check against plain-JAX broadcast semantics
    ref = (x - mean[None, :, None, None]) / std[None, :, None, None]
    assert out.shape == ref.shape
    assert jnp.allclose(out, ref, atol=1e-5, rtol=1e-5)

    print("KERNEL_OK")
</pallas_src>

<mosaic_0001>
module attributes {stable_mosaic.version = 11 : i64} {
  func.func @_normalize_kernel(%arg0: i32, %arg1: i32, %arg2: memref<8x1xf32, #tpu.memory_space<vmem>>, %arg3: memref<8x1xf32, #tpu.memory_space<vmem>>, %arg4: memref<8x128xf32, #tpu.memory_space<vmem>>, %arg5: memref<8x128xf32, #tpu.memory_space<vmem>>) attributes {dimension_semantics = [#tpu.dimension_semantics<parallel>, #tpu.dimension_semantics<parallel>], iteration_bounds = array<i64: 1, 2>, scalar_prefetch = 0 : i64, scratch_operands = 0 : i64, tpu.core_type = #tpu.core_type<tc>, window_params = [{transform_indices = @transform_0, window_bounds = array<i64: 8, 1>}, {transform_indices = @transform_1, window_bounds = array<i64: 8, 1>}, {transform_indices = @transform_2, window_bounds = array<i64: 8, 128>}, {transform_indices = @transform_3, window_bounds = array<i64: 8, 128>}]} {
    %c0 = arith.constant 0 : index
    %c0_0 = arith.constant 0 : index
    %0 = vector.load %arg4[%c0, %c0_0] : memref<8x128xf32, #tpu.memory_space<vmem>>, vector<8x128xf32>
    %c0_1 = arith.constant 0 : index
    %c0_2 = arith.constant 0 : index
    %1 = vector.load %arg2[%c0_1, %c0_2] : memref<8x1xf32, #tpu.memory_space<vmem>>, vector<8x1xf32>
    %2 = vector.broadcast %1 : vector<8x1xf32> to vector<8x128xf32>
    %3 = arith.mulf %0, %2 : vector<8x128xf32>
    %c0_3 = arith.constant 0 : index
    %c0_4 = arith.constant 0 : index
    %4 = vector.load %arg3[%c0_3, %c0_4] : memref<8x1xf32, #tpu.memory_space<vmem>>, vector<8x1xf32>
    %5 = vector.broadcast %4 : vector<8x1xf32> to vector<8x128xf32>
    %6 = arith.addf %3, %5 : vector<8x128xf32>
    %c0_5 = arith.constant 0 : index
    %c0_6 = arith.constant 0 : index
    %7 = vector.load %arg5[%c0_5, %c0_6] : memref<8x128xf32, #tpu.memory_space<vmem>>, vector<8x128xf32>
    tpu.vector_store %arg5[%c0_5, %c0_6], %6 {strides = array<i32>} : memref<8x128xf32, #tpu.memory_space<vmem>>, vector<8x128xf32>,
    return
  }
  func.func @transform_0(%arg0: i32, %arg1: i32) -> (i32, i32) {
    %c0_i32 = arith.constant 0 : i32
    %c0_i32_0 = arith.constant 0 : i32
    return %arg0, %c0_i32 : i32, i32
  }
  func.func @transform_1(%arg0: i32, %arg1: i32) -> (i32, i32) {
    %c0_i32 = arith.constant 0 : i32
    %c0_i32_0 = arith.constant 0 : i32
    return %arg0, %c0_i32 : i32, i32
  }
  func.func @transform_2(%arg0: i32, %arg1: i32) -> (i32, i32) {
    %c0_i32 = arith.constant 0 : i32
    return %arg0, %arg1 : i32, i32
  }
  func.func @transform_3(%arg0: i32, %arg1: i32) -> (i32, i32) {
    %c0_i32 = arith.constant 0 : i32
    return %arg0, %arg1 : i32, i32
  }
}

</mosaic_0001>

<bundles_post_ra>
// kernel: tpu_custom_call.1
= control target key start
LH: loop header
LB: loop body
LE: loop exit
PB: predicated region body
PF: predicated region fallthrough
CT: control target
= control target key end

     0   :  { %8 = vsyncpa [#allocation3], 0  ;;  %s641_s0 = inlined_call_operand.vmem [shape: f32[8,1], index: 0, kind: input, shape index: {}]   ;;  %s642_s1 = inlined_call_operand.vmem [shape: f32[8,1], index: 1, kind: input, shape index: {}]   ;;  %s643_s2 = inlined_call_operand.vmem [shape: f32[8,256], index: 2, kind: input, shape index: {}]   ;;  %s644_s3 = inlined_call_operand.hbm [shape: f32[8,256], index: 3, kind: output, shape index: {}]  }
   0x1   :  { %10 = vsyncpa [#allocation3 + $0x1], 0  ;;  %s538_s12 = smov 0   ;;  %s540_s13 = smov 0  }
   0x2   :  { %s542_s14 = smov 0   ;;  %s544_s15 = smov 0  }
   0x3   :  { %s546_s16 = smov 0   ;;  %s548_s17 = smov 0  }
   0x4 LB: > { %s367_s18 = sadd.s32 4294967295, %s515_s17   ;;  %s368_s19 = sadd.s32 4294967294, %s515_s17   ;;  %s515_s17 = sphi %s548_s17, %s16_s17   ;;  %s511_s16 = sphi %s546_s16, %s651_s16   ;;  %s507_s15 = sphi %s544_s15, %s650_s15   ;;  %s503_s14 = sphi %s542_s14, %s649_s14   ;;  %s499_s13 = sphi %s540_s13, %s648_s13   ;;  %s495_s12 = sphi %s538_s12, %s647_s12  }
   0x5   : > { %s25_s20 = sadd.s32 1, %s511_s16  ;;  %s117_s21 = sadd.s32 1, %s503_s14 }
   0x6   : > { %p26_p0 = scmp.ge.s32.totalorder %s25_s20, 2  ;;  %p127_p1 = scmp.ne.s32.totalorder %s503_s14, %s499_s13 }
   0x7   : > { %p128_p2 = scmp.eq.s32.totalorder %s367_s18, 1  ;;  %p133_p3 = scmp.ne.s32.totalorder %s499_s13, %s495_s12 }
   0x8   : > { %s653_s20 = smov (%p26_p0, %s25_s20), 0  ;;  %p134_p5 = scmp.eq.s32.totalorder %s368_s19, 1 }
   0x9   : > { %p578_p4 = por %p128_p2, %p127_p1  ;;  %s113_s23 = ssub.s32 %s511_s16, %s653_s20 }
   0xa   : > { %p373_p6 = scmp.ge.s32.totalorder %s515_s17, 1  ;;  %p115_p7 = scmp.eq.s32.totalorder %s113_s23, 0 }
   0xb   : > { %p585_p8 = por %p134_p5, %p133_p3  ;;  %p177_p9 = scmp.lt.s32.totalorder %s515_s17, 3 }
   0xc   : > { %s591_s25 = scalar_select %p115_p7, %s503_s14, %s117_s21  }
   0xd   : > { %p178_p10 = pnand %p373_p6, %p177_p9 }
   0xe   : > { %p222_p11 = scmp.lt.s32.totalorder (!%p178_p10), %s507_s15, 1  ;;  %s209_s4 = sand.u32 (!%p178_p10), 1, %s499_s13  }
   0xf   : > { %181 = sbr.rel (%p178_p10) target bundleno = 150 (0x96), region = 32  ;;  %s374_s6 = sshll.u32 (!%p178_p10), %s209_s4, 3 }
  0x10   : > { %s377_s7 = sshll.u32 (!%p178_p10), %s507_s15, 3  ;;  %s211_s21 = scalar_lea.vmem (!%p178_p10), [#allocation2], %s374_s6 }
  0x11   : > { %s257_s19 = scalar_lea.hbm (!%p178_p10), %s644_s3, %s377_s7  ;;  %s259_s23 = sshll.u32 (!%p178_p10), %s211_s21, 4  ;;  %s260_s23 = int_to_ptr.vmem [resolvable:$true] %s259_s23 }
  0x12   : > { %s261_s26 = sshll.u32 (!%p178_p10), %s257_s19, 4  ;;  %s262_s26 = int_to_ptr.hbm [resolvable:$true] %s261_s26 }
  0x13   : > { %s451_s27 = sshra.s32 (!%p178_p10), %s262_s26, 4  ;;  %s452_s27 = int_to_ptr.hbm [resolvable:$true] %s451_s27 }
  0x14   : > { %v229_v0 = vld [vmem:[%s641_s0] sm:$0xff]  ;;  %v517_v1 = vmov 0   ;;  %s223_s30 = scalar_select %p222_p11, %s507_s15, 1 }
  0x15   : > { %436 = vset.pattern.permute.xlu0 %v517_v1  ;;  %v236_v2 = vld [vmem:[%s642_s1] sm:$0xff]  ;;  %s245_s15 = scalar_lea.sflag [#allocation3], %s209_s4  ;;  %s453_s28 = scalar_lea.hbm %s452_s27, 8 }
  0x16   : > { %232 = vperm.xlu0 %436, %v229_v0   ;;  %s375_s5 = sshll.u32 %s223_s30, 3  ;;  %p454_p12 = scmp.ne.s32.totalorder %s452_s27, %s453_s28 }
  0x17   : > { %s227_s10 = scalar_lea.vmem %s643_s2, %s375_s5  ;;  %s457_s5 = scalar_lea.hbm %s644_s3, 16 }
  0x18   : > { %v228_v4 = vld [vmem:[%s227_s10] sm:$0xff]  ;;  %p455_p13 = pnand %p454_p12, %p578_p4  ;;  %p458_p1 = scmp.lt.s32.totalorder %s452_s27, %s644_s3 }
  0x19   : > { %p459_p2 = scmp.lt.s32.totalorder %s457_s5, %s453_s28 }
  0x1a   : > { %p456_p0 = pneg %p455_p13 }
  0x1b   : > { %p460_p3 = por %p459_p2, %p458_p1 }
  0x1d   : > { %p461_p5 = pnand %p460_p3, %p456_p0 }
  0x1e   : > { %239 = vperm.xlu0 %436, %v236_v2  }
  0x88   : > { %v233_v3 = vpop.permute.xlu0 %232 }
  0x89   : > { %v235_v5 = vmul.f32 %v233_v3, %v228_v4 }
  0x90   : > { %v240_v6 = vpop.permute.xlu0 %239 }
  0x91   : > { %v242_v7 = vadd.f32 %v240_v6, %v235_v5 }
  0x93   : > { %243 = vst [vmem:[%s211_s21] sm:$0xff] %v242_v7 }
  0x94   : > { %464 = shalt.err (!%p461_p5)
}
  0x95   : > { %380 = dma.vmem_to_hbm [thread:$0]  (%p578_p4), %s260_s23, 128, %s262_s26, %s245_s15  }
  0x96 PF: > { %p386_p6 = scmp.ge.s32.totalorder %s515_s17, 2  ;;  %s273_s4 = sand.u32 1, %s495_s12  }
  0x97   : > { %s274_s8 = scalar_lea.sflag [#allocation3], %s273_s4 }
  0x98   : > { %p383_p7 = pnand %p386_p6, %p585_p8 }
  0x9a   : > { %p384_p9 = pneg %p383_p7 }
  0x9c   : > { %490 = dma.done.wait (%p384_p9), %s274_s8, 128  }
  0x9d   : > { %492 = vsyncadd (%p384_p9), %s274_s8, 4294967168  ;;  %s16_s17 = sadd.s32 1, %s515_s17   ;;  %s647_s12 = smov %s499_s13 }
  0x9e   : > { %p13_p10 = scmp.ge.s32.totalorder %s16_s17, 4   ;;  %s648_s13 = smov %s503_s14 }
  0x9f   : > { %s649_s14 = smov %s591_s25  ;;  %s650_s15 = smov %s511_s16 }
  0xa0   : > { %s651_s16 = smov %s653_s20  ;;  %15 = sbr.rel (!%p13_p10) target bundleno = 4 (0x4), region = 73 }
  0xa5   :  { %280 = vsyncpa [#allocation3], 1 }
  0xa6   :  { %282 = vsyncpa [#allocation3 + $0x1], 1 }

</bundles_post_ra>
